<compile_context>
chip_gen: v6e
topology: v6e:2x2x1
jax: 0.10.0
libtpu: 0.0.40
codegen_flags: <defaults>
</compile_context>

<pallas_src>
import functools

import jax
import jax.numpy as jnp
from jax import lax
from jax.experimental import pallas as pl
from jax.experimental.pallas import tpu as pltpu

# ---- model dims (small, consistent with an OPT-style decoder layer) ----
BATCH = 2
SEQ = 8
HIDDEN = 32
NUM_HEADS = 4
HEAD_DIM = HIDDEN // NUM_HEADS
FFN = 64
LN_EPS = 1e-5

# Packed-slab geometry (lane-dense, (8,128)-tile friendly).
VEC_ROWS = 8            # 8 x 128 f32  -> one tile
WT_ROWS = 3 * HIDDEN + FFN   # 160 x 128 f32


def _layer_norm(h, g, b):
    mean = jnp.mean(h, axis=-1, keepdims=True)
    var = jnp.mean((h - mean) ** 2, axis=-1, keepdims=True)
    return (h - mean) * jax.lax.rsqrt(var + LN_EPS) * g + b


def decoder_layer_kernel(
    x_ref, vec_ref, wt_ref, o_ref,
    *, batch, seq, num_heads, head_dim, ffn,
):
    hidden = num_heads * head_dim
    d = hidden

    # `your_input_modification` is the identity -> consume hidden_states as-is.
    x = x_ref[...].astype(jnp.float32)          # (B*S, D)

    # ---- unpack the lane-dense parameter slabs (static slices, no DMA) ----
    vec = vec_ref[...]                          # (8, 128)
    g1 = vec[0:1, :d]
    b1 = vec[1:2, :d]
    bqkv = vec[2:3, :3 * d]                     # q-part already scaled
    bo = vec[3:4, :d]
    g2 = vec[4:5, :d]
    b2 = vec[5:6, :d]
    bf1 = vec[6:7, :ffn]
    bf2 = vec[7:8, :d]

    wqkv = wt_ref[0:d, 0:3 * d]                 # (D, 3D), q columns pre-scaled
    wo = wt_ref[d:2 * d, 0:d]                   # (D, D)
    w1 = wt_ref[2 * d:3 * d, 0:ffn]             # (D, FFN)
    w2 = wt_ref[3 * d:3 * d + ffn, 0:d]         # (FFN, D)

    # ---- causal additive mask generated in-kernel (no HBM input) ----
    # TODO(synk): arbitrary / padding attention_mask inputs are not supported;
    # the perf review replaced the mask DMA with an in-kernel causal mask.
    row = lax.broadcasted_iota(jnp.int32, (seq, seq), 0)
    col = lax.broadcasted_iota(jnp.int32, (seq, seq), 1)
    mask = jnp.where(col <= row, jnp.float32(0.0), jnp.float32(-1e9))  # (S, S)

    # --- self-attention block ---
    residual = x
    h = _layer_norm(x, g1, b1)

    # Fused QKV: single (B*S, D) x (D, 3D) MXU push + one bias add.
    qkv = jnp.dot(h, wqkv, preferred_element_type=jnp.float32) + bqkv
    q3 = qkv[:, :d].reshape(batch, seq, d)             # already scaled
    k3 = qkv[:, d:2 * d].reshape(batch, seq, d)
    v3 = qkv[:, 2 * d:3 * d].reshape(batch, seq, d)

    head_outs = []
    for hh in range(num_heads):                 # static loop; each step batched over B
        lo = hh * head_dim
        hi = lo + head_dim
        s = jnp.einsum("bqd,bkd->bqk", q3[:, :, lo:hi], k3[:, :, lo:hi],
                       preferred_element_type=jnp.float32) + mask     # (B,S,S)
        s = s - jnp.max(s, axis=-1, keepdims=True)
        p = jnp.exp(s)
        denom = jnp.maximum(jnp.sum(p, axis=-1, keepdims=True), 1e-20)
        p = p * pl.reciprocal(denom, approx=True)                     # EUP, not VPU divide
        head_outs.append(jnp.einsum("bqk,bkd->bqd", p, v3[:, :, lo:hi],
                                    preferred_element_type=jnp.float32))
    attn = jnp.concatenate(head_outs, axis=-1).reshape(batch * seq, hidden)
    attn = jnp.dot(attn, wo, preferred_element_type=jnp.float32) + bo
    x = residual + attn

    # --- feed-forward block ---
    residual2 = x
    h2 = _layer_norm(x, g2, b2)
    f = jnp.dot(h2, w1, preferred_element_type=jnp.float32) + bf1
    f = jnp.maximum(f, 0.0)                     # ReLU (OPT activation)
    f = jnp.dot(f, w2, preferred_element_type=jnp.float32) + bf2

    # Single store for the whole problem (one invocation, no grid steps).
    o_ref[...] = (residual2 + f).astype(o_ref.dtype)


def pack_params(params):
    """Pack all layer parameters into two lane-dense slabs (called ONCE)."""
    d, f = HIDDEN, FFN
    scale = HEAD_DIM ** -0.5
    # Fused QKV with the attention scale folded into the q columns.
    wqkv = jnp.concatenate([params["wq"] * scale, params["wk"], params["wv"]],
                           axis=1)                                  # (D, 3D)
    bqkv = jnp.concatenate([params["bq"] * scale, params["bk"], params["bv"]],
                           axis=1)                                  # (1, 3D)

    vec = jnp.zeros((VEC_ROWS, 128), jnp.float32)
    vec = vec.at[0, :d].set(params["ln1_g"][0])
    vec = vec.at[1, :d].set(params["ln1_b"][0])
    vec = vec.at[2, :3 * d].set(bqkv[0])
    vec = vec.at[3, :d].set(params["bo"][0])
    vec = vec.at[4, :d].set(params["ln2_g"][0])
    vec = vec.at[5, :d].set(params["ln2_b"][0])
    vec = vec.at[6, :f].set(params["bf1"][0])
    vec = vec.at[7, :d].set(params["bf2"][0])

    wt = jnp.zeros((WT_ROWS, 128), jnp.float32)
    wt = wt.at[0:d, :3 * d].set(wqkv)
    wt = wt.at[d:2 * d, :d].set(params["wo"])
    wt = wt.at[2 * d:3 * d, :f].set(params["w1"])
    wt = wt.at[3 * d:3 * d + f, :d].set(params["w2"])
    return vec, wt


def custom_layer_wrapper_forward(hidden_states, packed_params, attention_mask=None):
    """Pallas equivalent of CustomLayerWrapper.forward.

    Returns the new hidden_states (first element of the HF-style tuple).
    attention_mask=None means the standard causal mask, generated in-kernel.
    """
    # TODO(synk): output_attentions / use_cache / past_key_value /
    # layer_head_mask branches of the wrapped HF layer are not exercised
    # (wrapper passes None) and are omitted.
    del attention_mask
    B, S, D = hidden_states.shape
    x2d = hidden_states.reshape(B * S, D)
    vec_slab, wt_slab = packed_params

    kernel = functools.partial(
        decoder_layer_kernel,
        batch=B, seq=S, num_heads=NUM_HEADS, head_dim=HEAD_DIM, ffn=FFN,
    )

    out2d = pl.pallas_call(
        kernel,
        out_shape=jax.ShapeDtypeStruct((B * S, D), hidden_states.dtype),
        # No grid: everything (~100 KB) is resident in VMEM for one invocation.
        # If this layer is called many times per step, fuse the calls (grid
        # over layers / token blocks) instead of re-launching this kernel.
    )(x2d, vec_slab, wt_slab)
    return out2d.reshape(B, S, D)


def _reference_forward(hidden_states, params):
    """Pure-JAX reference for validation (exact softmax division)."""
    i = jnp.arange(SEQ)[:, None]
    j = jnp.arange(SEQ)[None, :]
    mask = jnp.where(j <= i, 0.0, -1e9).astype(jnp.float32)

    def one(x):
        residual = x
        h = _layer_norm(x, params["ln1_g"], params["ln1_b"])
        q = h @ params["wq"] + params["bq"]
        k = h @ params["wk"] + params["bk"]
        v = h @ params["wv"] + params["bv"]
        q = q * (HEAD_DIM ** -0.5)
        outs = []
        for hh in range(NUM_HEADS):
            lo, hi = hh * HEAD_DIM, (hh + 1) * HEAD_DIM
            s = q[:, lo:hi] @ k[:, lo:hi].T + mask
            p = jax.nn.softmax(s, axis=-1)
            outs.append(p @ v[:, lo:hi])
        attn = jnp.concatenate(outs, axis=-1) @ params["wo"] + params["bo"]
        x = residual + attn
        residual2 = x
        h2 = _layer_norm(x, params["ln2_g"], params["ln2_b"])
        f = jnp.maximum(h2 @ params["w1"] + params["bf1"], 0.0)
        f = f @ params["w2"] + params["bf2"]
        return residual2 + f

    return jax.vmap(one)(hidden_states)


def init_params(key):
    ks = jax.random.split(key, 8)
    scale = 0.02
    return {
        "ln1_g": jnp.ones((1, HIDDEN), jnp.float32),
        "ln1_b": jnp.zeros((1, HIDDEN), jnp.float32),
        "wq": scale * jax.random.normal(ks[0], (HIDDEN, HIDDEN), jnp.float32),
        "bq": jnp.zeros((1, HIDDEN), jnp.float32),
        "wk": scale * jax.random.normal(ks[1], (HIDDEN, HIDDEN), jnp.float32),
        "bk": jnp.zeros((1, HIDDEN), jnp.float32),
        "wv": scale * jax.random.normal(ks[2], (HIDDEN, HIDDEN), jnp.float32),
        "bv": jnp.zeros((1, HIDDEN), jnp.float32),
        "wo": scale * jax.random.normal(ks[3], (HIDDEN, HIDDEN), jnp.float32),
        "bo": jnp.zeros((1, HIDDEN), jnp.float32),
        "ln2_g": jnp.ones((1, HIDDEN), jnp.float32),
        "ln2_b": jnp.zeros((1, HIDDEN), jnp.float32),
        "w1": scale * jax.random.normal(ks[4], (HIDDEN, FFN), jnp.float32),
        "bf1": jnp.zeros((1, FFN), jnp.float32),
        "w2": scale * jax.random.normal(ks[5], (FFN, HIDDEN), jnp.float32),
        "bf2": jnp.zeros((1, HIDDEN), jnp.float32),
    }


if __name__ == "__main__":
    key = jax.random.PRNGKey(0)
    k_x, k_p = jax.random.split(key)

    hidden_states = jax.random.normal(k_x, (BATCH, SEQ, HIDDEN), jnp.float32)
    params = init_params(k_p)

    # Packing hoisted out of the per-call path (weights are static).
    packed = pack_params(params)

    out = custom_layer_wrapper_forward(hidden_states, packed)
    out = jax.block_until_ready(out)

    ref = _reference_forward(hidden_states, params)
    assert out.shape == (BATCH, SEQ, HIDDEN)
    # Tolerance slightly relaxed vs. 1e-4 because the kernel softmax uses the
    # hardware approximate reciprocal (EUP) instead of an exact divide.
    assert jnp.allclose(out, ref, atol=1e-3, rtol=1e-3)

    print("KERNEL_OK")
</pallas_src>

<mosaic_0001>
module attributes {stable_mosaic.version = 11 : i64} {
  func.func @decoder_layer_kernel(%arg0: memref<16x32xf32, #tpu.memory_space<vmem>>, %arg1: memref<8x128xf32, #tpu.memory_space<vmem>>, %arg2: memref<160x128xf32, #tpu.memory_space<vmem>>, %arg3: memref<16x32xf32, #tpu.memory_space<vmem>>) attributes {dimension_semantics = [], scalar_prefetch = 0 : i64, scratch_operands = 0 : i64, tpu.core_type = #tpu.core_type<tc>} {
    %c0 = arith.constant 0 : index
    %c0_0 = arith.constant 0 : index
    %0 = vector.load %arg0[%c0, %c0_0] : memref<16x32xf32, #tpu.memory_space<vmem>>, vector<16x32xf32>
    %c0_1 = arith.constant 0 : index
    %c0_2 = arith.constant 0 : index
    %1 = vector.load %arg1[%c0_1, %c0_2] : memref<8x128xf32, #tpu.memory_space<vmem>>, vector<8x128xf32>
    %2 = vector.extract_strided_slice %1 {offsets = [0, 0], sizes = [1, 32], strides = [1, 1]} : vector<8x128xf32> to vector<1x32xf32>
    %3 = vector.extract_strided_slice %1 {offsets = [1, 0], sizes = [1, 32], strides = [1, 1]} : vector<8x128xf32> to vector<1x32xf32>
    %4 = vector.extract_strided_slice %1 {offsets = [2, 0], sizes = [1, 96], strides = [1, 1]} : vector<8x128xf32> to vector<1x96xf32>
    %5 = vector.extract_strided_slice %1 {offsets = [3, 0], sizes = [1, 32], strides = [1, 1]} : vector<8x128xf32> to vector<1x32xf32>
    %6 = vector.extract_strided_slice %1 {offsets = [4, 0], sizes = [1, 32], strides = [1, 1]} : vector<8x128xf32> to vector<1x32xf32>
    %7 = vector.extract_strided_slice %1 {offsets = [5, 0], sizes = [1, 32], strides = [1, 1]} : vector<8x128xf32> to vector<1x32xf32>
    %8 = vector.extract_strided_slice %1 {offsets = [6, 0], sizes = [1, 64], strides = [1, 1]} : vector<8x128xf32> to vector<1x64xf32>
    %9 = vector.extract_strided_slice %1 {offsets = [7, 0], sizes = [1, 32], strides = [1, 1]} : vector<8x128xf32> to vector<1x32xf32>
    %c0_3 = arith.constant 0 : index
    %c0_4 = arith.constant 0 : index
    %10 = vector.load %arg2[%c0_3, %c0_4] : memref<160x128xf32, #tpu.memory_space<vmem>>, vector<32x96xf32>
    %c32 = arith.constant 32 : index
    %c0_5 = arith.constant 0 : index
    %11 = vector.load %arg2[%c32, %c0_5] : memref<160x128xf32, #tpu.memory_space<vmem>>, vector<32x32xf32>
    %c64 = arith.constant 64 : index
    %c0_6 = arith.constant 0 : index
    %12 = vector.load %arg2[%c64, %c0_6] : memref<160x128xf32, #tpu.memory_space<vmem>>, vector<32x64xf32>
    %c96 = arith.constant 96 : index
    %c0_7 = arith.constant 0 : index
    %13 = vector.load %arg2[%c96, %c0_7] : memref<160x128xf32, #tpu.memory_space<vmem>>, vector<64x32xf32>
    %14 = tpu.iota {dimensions = array<i32: 0>} : vector<8x8xi32>
    %15 = tpu.iota {dimensions = array<i32: 1>} : vector<8x8xi32>
    %16 = arith.cmpi sle, %15, %14 : vector<8x8xi32>
    %cst = arith.constant 0.000000e+00 : f32
    %cst_8 = arith.constant -1.000000e+09 : f32
    %17 = vector.broadcast %cst : f32 to vector<8x8xf32>
    %18 = vector.broadcast %cst_8 : f32 to vector<8x8xf32>
    %19 = arith.select %16, %17, %18 : vector<8x8xi1>, vector<8x8xf32>
    %cst_9 = arith.constant dense<0.000000e+00> : vector<16xf32>
    %20 = vector.multi_reduction <add>, %0, %cst_9 [1] : vector<16x32xf32> to vector<16xf32>
    %21 = vector.shape_cast %20 : vector<16xf32> to vector<16x1xf32>
    %cst_10 = arith.constant 3.200000e+01 : f32
    %22 = vector.broadcast %cst_10 : f32 to vector<16x1xf32>
    %23 = arith.divf %21, %22 : vector<16x1xf32>
    %24 = vector.broadcast %23 : vector<16x1xf32> to vector<16x32xf32>
    %25 = arith.subf %0, %24 : vector<16x32xf32>
    %26 = arith.mulf %25, %25 : vector<16x32xf32>
    %cst_11 = arith.constant dense<0.000000e+00> : vector<16xf32>
    %27 = vector.multi_reduction <add>, %26, %cst_11 [1] : vector<16x32xf32> to vector<16xf32>
    %28 = vector.shape_cast %27 : vector<16xf32> to vector<16x1xf32>
    %cst_12 = arith.constant 3.200000e+01 : f32
    %29 = vector.broadcast %cst_12 : f32 to vector<16x1xf32>
    %30 = arith.divf %28, %29 : vector<16x1xf32>
    %31 = vector.broadcast %23 : vector<16x1xf32> to vector<16x32xf32>
    %32 = arith.subf %0, %31 : vector<16x32xf32>
    %cst_13 = arith.constant 9.99999974E-6 : f32
    %33 = vector.broadcast %cst_13 : f32 to vector<16x1xf32>
    %34 = arith.addf %30, %33 : vector<16x1xf32>
    %35 = math.rsqrt %34 : vector<16x1xf32>
    %36 = vector.broadcast %35 : vector<16x1xf32> to vector<16x32xf32>
    %37 = arith.mulf %32, %36 : vector<16x32xf32>
    %38 = vector.broadcast %2 : vector<1x32xf32> to vector<16x32xf32>
    %39 = arith.mulf %37, %38 : vector<16x32xf32>
    %40 = vector.broadcast %3 : vector<1x32xf32> to vector<16x32xf32>
    %41 = arith.addf %39, %40 : vector<16x32xf32>
    %cst_14 = arith.constant dense<0.000000e+00> : vector<16x96xf32>
    %42 = tpu.matmul %41, %10, %cst_14 {dimension_numbers = #tpu.dot_dimension_numbers<[1], [0], [0], [1], [0, 0, 1, 1], [], []>} : vector<16x32xf32>, vector<32x96xf32>, vector<16x96xf32> -> vector<16x96xf32>
    %43 = vector.broadcast %4 : vector<1x96xf32> to vector<16x96xf32>
    %44 = arith.addf %42, %43 : vector<16x96xf32>
    %45 = vector.extract_strided_slice %44 {offsets = [0, 0], sizes = [16, 32], strides = [1, 1]} : vector<16x96xf32> to vector<16x32xf32>
    %46 = vector.shape_cast %45 : vector<16x32xf32> to vector<2x8x32xf32>
    %47 = vector.extract_strided_slice %44 {offsets = [0, 32], sizes = [16, 32], strides = [1, 1]} : vector<16x96xf32> to vector<16x32xf32>
    %48 = vector.shape_cast %47 : vector<16x32xf32> to vector<2x8x32xf32>
    %49 = vector.extract_strided_slice %44 {offsets = [0, 64], sizes = [16, 32], strides = [1, 1]} : vector<16x96xf32> to vector<16x32xf32>
    %50 = vector.shape_cast %49 : vector<16x32xf32> to vector<2x8x32xf32>
    %51 = vector.extract_strided_slice %46 {offsets = [0, 0, 0], sizes = [2, 8, 8], strides = [1, 1, 1]} : vector<2x8x32xf32> to vector<2x8x8xf32>
    %52 = vector.extract_strided_slice %48 {offsets = [0, 0, 0], sizes = [2, 8, 8], strides = [1, 1, 1]} : vector<2x8x32xf32> to vector<2x8x8xf32>
    "tpu.trace_start"() <{level = 10 : i32, message = "bqd,bkd->bqk"}> : () -> ()
    %cst_15 = arith.constant dense<0.000000e+00> : vector<2x8x8xf32>
    %53 = tpu.matmul %51, %52, %cst_15 {dimension_numbers = #tpu.dot_dimension_numbers<[2], [2], [1], [1], [0, 0, 0, 1, 1, 1], [0], [0]>} : vector<2x8x8xf32>, vector<2x8x8xf32>, vector<2x8x8xf32> -> vector<2x8x8xf32>
    "tpu.trace_stop"() : () -> ()
    %54 = vector.shape_cast %19 : vector<8x8xf32> to vector<1x8x8xf32>
    %55 = vector.broadcast %54 : vector<1x8x8xf32> to vector<2x8x8xf32>
    %56 = arith.addf %53, %55 : vector<2x8x8xf32>
    %cst_16 = arith.constant dense<0xFF800000> : vector<2x8xf32>
    %57 = vector.multi_reduction <maximumf>, %56, %cst_16 [2] : vector<2x8x8xf32> to vector<2x8xf32>
    %58 = vector.shape_cast %57 : vector<2x8xf32> to vector<2x8x1xf32>
    %59 = vector.broadcast %58 : vector<2x8x1xf32> to vector<2x8x8xf32>
    %60 = arith.subf %56, %59 : vector<2x8x8xf32>
    %61 = math.exp %60 : vector<2x8x8xf32>
    %cst_17 = arith.constant dense<0.000000e+00> : vector<2x8xf32>
    %62 = vector.multi_reduction <add>, %61, %cst_17 [2] : vector<2x8x8xf32> to vector<2x8xf32>
    %63 = vector.shape_cast %62 : vector<2x8xf32> to vector<2x8x1xf32>
    %cst_18 = arith.constant 9.99999968E-21 : f32
    %64 = vector.broadcast %cst_18 : f32 to vector<2x8x1xf32>
    %65 = arith.maximumf %63, %64 : vector<2x8x1xf32>
    %66 = tpu.reciprocal %65 {approx = true} : vector<2x8x1xf32> -> vector<2x8x1xf32>
    %67 = vector.broadcast %66 : vector<2x8x1xf32> to vector<2x8x8xf32>
    %68 = arith.mulf %61, %67 : vector<2x8x8xf32>
    %69 = vector.extract_strided_slice %50 {offsets = [0, 0, 0], sizes = [2, 8, 8], strides = [1, 1, 1]} : vector<2x8x32xf32> to vector<2x8x8xf32>
    "tpu.trace_start"() <{level = 10 : i32, message = "bqk,bkd->bqd"}> : () -> ()
    %cst_19 = arith.constant dense<0.000000e+00> : vector<2x8x8xf32>
    %70 = tpu.matmul %68, %69, %cst_19 {dimension_numbers = #tpu.dot_dimension_numbers<[2], [1], [1], [2], [0, 0, 0, 1, 1, 2], [0], [0]>} : vector<2x8x8xf32>, vector<2x8x8xf32>, vector<2x8x8xf32> -> vector<2x8x8xf32>
    "tpu.trace_stop"() : () -> ()
    %71 = vector.extract_strided_slice %46 {offsets = [0, 0, 8], sizes = [2, 8, 8], strides = [1, 1, 1]} : vector<2x8x32xf32> to vector<2x8x8xf32>
    %72 = vector.extract_strided_slice %48 {offsets = [0, 0, 8], sizes = [2, 8, 8], strides = [1, 1, 1]} : vector<2x8x32xf32> to vector<2x8x8xf32>
    "tpu.trace_start"() <{level = 10 : i32, message = "bqd,bkd->bqk"}> : () -> ()
    %cst_20 = arith.constant dense<0.000000e+00> : vector<2x8x8xf32>
    %73 = tpu.matmul %71, %72, %cst_20 {dimension_numbers = #tpu.dot_dimension_numbers<[2], [2], [1], [1], [0, 0, 0, 1, 1, 1], [0], [0]>} : vector<2x8x8xf32>, vector<2x8x8xf32>, vector<2x8x8xf32> -> vector<2x8x8xf32>
    "tpu.trace_stop"() : () -> ()
    %74 = vector.shape_cast %19 : vector<8x8xf32> to vector<1x8x8xf32>
    %75 = vector.broadcast %74 : vector<1x8x8xf32> to vector<2x8x8xf32>
    %76 = arith.addf %73, %75 : vector<2x8x8xf32>
    %cst_21 = arith.constant dense<0xFF800000> : vector<2x8xf32>
    %77 = vector.multi_reduction <maximumf>, %76, %cst_21 [2] : vector<2x8x8xf32> to vector<2x8xf32>
    %78 = vector.shape_cast %77 : vector<2x8xf32> to vector<2x8x1xf32>
    %79 = vector.broadcast %78 : vector<2x8x1xf32> to vector<2x8x8xf32>
    %80 = arith.subf %76, %79 : vector<2x8x8xf32>
    %81 = math.exp %80 : vector<2x8x8xf32>
    %cst_22 = arith.constant dense<0.000000e+00> : vector<2x8xf32>
    %82 = vector.multi_reduction <add>, %81, %cst_22 [2] : vector<2x8x8xf32> to vector<2x8xf32>
    %83 = vector.shape_cast %82 : vector<2x8xf32> to vector<2x8x1xf32>
    %cst_23 = arith.constant 9.99999968E-21 : f32
    %84 = vector.broadcast %cst_23 : f32 to vector<2x8x1xf32>
    %85 = arith.maximumf %83, %84 : vector<2x8x1xf32>
    %86 = tpu.reciprocal %85 {approx = true} : vector<2x8x1xf32> -> vector<2x8x1xf32>
    %87 = vector.broadcast %86 : vector<2x8x1xf32> to vector<2x8x8xf32>
    %88 = arith.mulf %81, %87 : vector<2x8x8xf32>
    %89 = vector.extract_strided_slice %50 {offsets = [0, 0, 8], sizes = [2, 8, 8], strides = [1, 1, 1]} : vector<2x8x32xf32> to vector<2x8x8xf32>
    "tpu.trace_start"() <{level = 10 : i32, message = "bqk,bkd->bqd"}> : () -> ()
    %cst_24 = arith.constant dense<0.000000e+00> : vector<2x8x8xf32>
    %90 = tpu.matmul %88, %89, %cst_24 {dimension_numbers = #tpu.dot_dimension_numbers<[2], [1], [1], [2], [0, 0, 0, 1, 1, 2], [0], [0]>} : vector<2x8x8xf32>, vector<2x8x8xf32>, vector<2x8x8xf32> -> vector<2x8x8xf32>
    "tpu.trace_stop"() : () -> ()
    %91 = vector.extract_strided_slice %46 {offsets = [0, 0, 16], sizes = [2, 8, 8], strides = [1, 1, 1]} : vector<2x8x32xf32> to vector<2x8x8xf32>
    %92 = vector.extract_strided_slice %48 {offsets = [0, 0, 16], sizes = [2, 8, 8], strides = [1, 1, 1]} : vector<2x8x32xf32> to vector<2x8x8xf32>
    "tpu.trace_start"() <{level = 10 : i32, message = "bqd,bkd->bqk"}> : () -> ()
    %cst_25 = arith.constant dense<0.000000e+00> : vector<2x8x8xf32>
    %93 = tpu.matmul %91, %92, %cst_25 {dimension_numbers = #tpu.dot_dimension_numbers<[2], [2], [1], [1], [0, 0, 0, 1, 1, 1], [0], [0]>} : vector<2x8x8xf32>, vector<2x8x8xf32>, vector<2x8x8xf32> -> vector<2x8x8xf32>
    "tpu.trace_stop"() : () -> ()
    %94 = vector.shape_cast %19 : vector<8x8xf32> to vector<1x8x8xf32>
    %95 = vector.broadcast %94 : vector<1x8x8xf32> to vector<2x8x8xf32>
    %96 = arith.addf %93, %95 : vector<2x8x8xf32>
    %cst_26 = arith.constant dense<0xFF800000> : vector<2x8xf32>
    %97 = vector.multi_reduction <maximumf>, %96, %cst_26 [2] : vector<2x8x8xf32> to vector<2x8xf32>
    %98 = vector.shape_cast %97 : vector<2x8xf32> to vector<2x8x1xf32>
    %99 = vector.broadcast %98 : vector<2x8x1xf32> to vector<2x8x8xf32>
    %100 = arith.subf %96, %99 : vector<2x8x8xf32>
    %101 = math.exp %100 : vector<2x8x8xf32>
    %cst_27 = arith.constant dense<0.000000e+00> : vector<2x8xf32>
    %102 = vector.multi_reduction <add>, %101, %cst_27 [2] : vector<2x8x8xf32> to vector<2x8xf32>
    %103 = vector.shape_cast %102 : vector<2x8xf32> to vector<2x8x1xf32>
    %cst_28 = arith.constant 9.99999968E-21 : f32
    %104 = vector.broadcast %cst_28 : f32 to vector<2x8x1xf32>
    %105 = arith.maximumf %103, %104 : vector<2x8x1xf32>
    %106 = tpu.reciprocal %105 {approx = true} : vector<2x8x1xf32> -> vector<2x8x1xf32>
    %107 = vector.broadcast %106 : vector<2x8x1xf32> to vector<2x8x8xf32>
    %108 = arith.mulf %101, %107 : vector<2x8x8xf32>
    %109 = vector.extract_strided_slice %50 {offsets = [0, 0, 16], sizes = [2, 8, 8], strides = [1, 1, 1]} : vector<2x8x32xf32> to vector<2x8x8xf32>
    "tpu.trace_start"() <{level = 10 : i32, message = "bqk,bkd->bqd"}> : () -> ()
    %cst_29 = arith.constant dense<0.000000e+00> : vector<2x8x8xf32>
    %110 = tpu.matmul %108, %109, %cst_29 {dimension_numbers = #tpu.dot_dimension_numbers<[2], [1], [1], [2], [0, 0, 0, 1, 1, 2], [0], [0]>} : vector<2x8x8xf32>, vector<2x8x8xf32>, vector<2x8x8xf32> -> vector<2x8x8xf32>
    "tpu.trace_stop"() : () -> ()
    %111 = vector.extract_strided_slice %46 {offsets = [0, 0, 24], sizes = [2, 8, 8], strides = [1, 1, 1]} : vector<2x8x32xf32> to vector<2x8x8xf32>
    %112 = vector.extract_strided_slice %48 {offsets = [0, 0, 24], sizes = [2, 8, 8], strides = [1, 1, 1]} : vector<2x8x32xf32> to vector<2x8x8xf32>
    "tpu.trace_start"() <{level = 10 : i32, message = "bqd,bkd->bqk"}> : () -> ()
    %cst_30 = arith.constant dense<0.000000e+00> : vector<2x8x8xf32>
    %113 = tpu.matmul %111, %112, %cst_30 {dimension_numbers = #tpu.dot_dimension_numbers<[2], [2], [1], [1], [0, 0, 0, 1, 1, 1], [0], [0]>} : vector<2x8x8xf32>, vector<2x8x8xf32>, vector<2x8x8xf32> -> vector<2x8x8xf32>
    "tpu.trace_stop"() : () -> ()
    %114 = vector.shape_cast %19 : vector<8x8xf32> to vector<1x8x8xf32>
    %115 = vector.broadcast %114 : vector<1x8x8xf32> to vector<2x8x8xf32>
    %116 = arith.addf %113, %115 : vector<2x8x8xf32>
    %cst_31 = arith.constant dense<0xFF800000> : vector<2x8xf32>
    %117 = vector.multi_reduction <maximumf>, %116, %cst_31 [2] : vector<2x8x8xf32> to vector<2x8xf32>
    %118 = vector.shape_cast %117 : vector<2x8xf32> to vector<2x8x1xf32>
    %119 = vector.broadcast %118 : vector<2x8x1xf32> to vector<2x8x8xf32>
    %120 = arith.subf %116, %119 : vector<2x8x8xf32>
    %121 = math.exp %120 : vector<2x8x8xf32>
    %cst_32 = arith.constant dense<0.000000e+00> : vector<2x8xf32>
    %122 = vector.multi_reduction <add>, %121, %cst_32 [2] : vector<2x8x8xf32> to vector<2x8xf32>
    %123 = vector.shape_cast %122 : vector<2x8xf32> to vector<2x8x1xf32>
    %cst_33 = arith.constant 9.99999968E-21 : f32
    %124 = vector.broadcast %cst_33 : f32 to vector<2x8x1xf32>
    %125 = arith.maximumf %123, %124 : vector<2x8x1xf32>
    %126 = tpu.reciprocal %125 {approx = true} : vector<2x8x1xf32> -> vector<2x8x1xf32>
    %127 = vector.broadcast %126 : vector<2x8x1xf32> to vector<2x8x8xf32>
    %128 = arith.mulf %121, %127 : vector<2x8x8xf32>
    %129 = vector.extract_strided_slice %50 {offsets = [0, 0, 24], sizes = [2, 8, 8], strides = [1, 1, 1]} : vector<2x8x32xf32> to vector<2x8x8xf32>
    "tpu.trace_start"() <{level = 10 : i32, message = "bqk,bkd->bqd"}> : () -> ()
    %cst_34 = arith.constant dense<0.000000e+00> : vector<2x8x8xf32>
    %130 = tpu.matmul %128, %129, %cst_34 {dimension_numbers = #tpu.dot_dimension_numbers<[2], [1], [1], [2], [0, 0, 0, 1, 1, 2], [0], [0]>} : vector<2x8x8xf32>, vector<2x8x8xf32>, vector<2x8x8xf32> -> vector<2x8x8xf32>
    "tpu.trace_stop"() : () -> ()
    %131 = tpu.concatenate %70, %90, %110, %130 in 2 : vector<2x8x8xf32>, vector<2x8x8xf32>, vector<2x8x8xf32>, vector<2x8x8xf32> -> vector<2x8x32xf32>
    %132 = vector.shape_cast %131 : vector<2x8x32xf32> to vector<16x32xf32>
    %cst_35 = arith.constant dense<0.000000e+00> : vector<16x32xf32>
    %133 = tpu.matmul %132, %11, %cst_35 {dimension_numbers = #tpu.dot_dimension_numbers<[1], [0], [0], [1], [0, 0, 1, 1], [], []>} : vector<16x32xf32>, vector<32x32xf32>, vector<16x32xf32> -> vector<16x32xf32>
    %134 = vector.broadcast %5 : vector<1x32xf32> to vector<16x32xf32>
    %135 = arith.addf %133, %134 : vector<16x32xf32>
    %136 = arith.addf %0, %135 : vector<16x32xf32>
    %cst_36 = arith.constant dense<0.000000e+00> : vector<16xf32>
    %137 = vector.multi_reduction <add>, %136, %cst_36 [1] : vector<16x32xf32> to vector<16xf32>
    %138 = vector.shape_cast %137 : vector<16xf32> to vector<16x1xf32>
    %cst_37 = arith.constant 3.200000e+01 : f32
    %139 = vector.broadcast %cst_37 : f32 to vector<16x1xf32>
    %140 = arith.divf %138, %139 : vector<16x1xf32>
    %141 = vector.broadcast %140 : vector<16x1xf32> to vector<16x32xf32>
    %142 = arith.subf %136, %141 : vector<16x32xf32>
    %143 = arith.mulf %142, %142 : vector<16x32xf32>
    %cst_38 = arith.constant dense<0.000000e+00> : vector<16xf32>
    %144 = vector.multi_reduction <add>, %143, %cst_38 [1] : vector<16x32xf32> to vector<16xf32>
    %145 = vector.shape_cast %144 : vector<16xf32> to vector<16x1xf32>
    %cst_39 = arith.constant 3.200000e+01 : f32
    %146 = vector.broadcast %cst_39 : f32 to vector<16x1xf32>
    %147 = arith.divf %145, %146 : vector<16x1xf32>
    %148 = vector.broadcast %140 : vector<16x1xf32> to vector<16x32xf32>
    %149 = arith.subf %136, %148 : vector<16x32xf32>
    %cst_40 = arith.constant 9.99999974E-6 : f32
    %150 = vector.broadcast %cst_40 : f32 to vector<16x1xf32>
    %151 = arith.addf %147, %150 : vector<16x1xf32>
    %152 = math.rsqrt %151 : vector<16x1xf32>
    %153 = vector.broadcast %152 : vector<16x1xf32> to vector<16x32xf32>
    %154 = arith.mulf %149, %153 : vector<16x32xf32>
    %155 = vector.broadcast %6 : vector<1x32xf32> to vector<16x32xf32>
    %156 = arith.mulf %154, %155 : vector<16x32xf32>
    %157 = vector.broadcast %7 : vector<1x32xf32> to vector<16x32xf32>
    %158 = arith.addf %156, %157 : vector<16x32xf32>
    %cst_41 = arith.constant dense<0.000000e+00> : vector<16x64xf32>
    %159 = tpu.matmul %158, %12, %cst_41 {dimension_numbers = #tpu.dot_dimension_numbers<[1], [0], [0], [1], [0, 0, 1, 1], [], []>} : vector<16x32xf32>, vector<32x64xf32>, vector<16x64xf32> -> vector<16x64xf32>
    %160 = vector.broadcast %8 : vector<1x64xf32> to vector<16x64xf32>
    %161 = arith.addf %159, %160 : vector<16x64xf32>
    %cst_42 = arith.constant 0.000000e+00 : f32
    %162 = vector.broadcast %cst_42 : f32 to vector<16x64xf32>
    %163 = arith.maximumf %161, %162 : vector<16x64xf32>
    %cst_43 = arith.constant dense<0.000000e+00> : vector<16x32xf32>
    %164 = tpu.matmul %163, %13, %cst_43 {dimension_numbers = #tpu.dot_dimension_numbers<[1], [0], [0], [1], [0, 0, 1, 1], [], []>} : vector<16x64xf32>, vector<64x32xf32>, vector<16x32xf32> -> vector<16x32xf32>
    %165 = vector.broadcast %9 : vector<1x32xf32> to vector<16x32xf32>
    %166 = arith.addf %164, %165 : vector<16x32xf32>
    %167 = arith.addf %136, %166 : vector<16x32xf32>
    %c0_44 = arith.constant 0 : index
    %c0_45 = arith.constant 0 : index
    %168 = vector.load %arg3[%c0_44, %c0_45] : memref<16x32xf32, #tpu.memory_space<vmem>>, vector<16x32xf32>
    tpu.vector_store %arg3[%c0_44, %c0_45], %167 {strides = array<i32>} : memref<16x32xf32, #tpu.memory_space<vmem>>, vector<16x32xf32>,
    return
  }
}

</mosaic_0001>

<bundles_post_ra>
// kernel: tpu_custom_call.1
= control target key start
LH: loop header
LB: loop body
LE: loop exit
PB: predicated region body
PF: predicated region fallthrough
CT: control target
= control target key end

     0   :  { %8 = vsyncpa [#allocation3], 0  ;;  %s2521_s0 = inlined_call_operand.hbm [shape: f32[16,32], index: 0, kind: input, shape index: {}]   ;;  %s2522_s1 = inlined_call_operand.hbm [shape: f32[8,128], index: 1, kind: input, shape index: {}]   ;;  %s2523_s2 = inlined_call_operand.hbm [shape: f32[160,128], index: 2, kind: input, shape index: {}]   ;;  %s2524_s3 = inlined_call_operand.hbm [shape: f32[16,32], index: 3, kind: output, shape index: {}]  }
   0x1   :  { %9 = vsyncpa [#allocation6], 0 }
   0x2   :  { %10 = vsyncpa [#allocation4], 0  ;;  %s2259_s12 = smov [#allocation5]   ;;  %s2260_s14 = smov [#allocation2]  }
   0x3   :  { %s29_s13 = sshll.u32 %s2259_s12, 4  ;;  %s16_s15 = sshll.u32 %s2260_s14, 4  ;;  %s30_s13 = int_to_ptr.vmem [resolvable:$true] %s29_s13  ;;  %s17_s15 = int_to_ptr.vmem [resolvable:$true] %s16_s15 }
   0x4   :  { %s2181_s16 = scalar_lea.vmem %s30_s13, 128  ;;  %p2186_p1 = scmp.lt.s32.totalorder %s30_s13, %s30_s13 }
   0x5   :  { %p2182_p0 = scmp.ne.s32.totalorder %s30_s13, %s2181_s16  ;;  %p2187_p2 = scmp.lt.s32.totalorder %s2181_s16, %s2181_s16 }
   0x7   :  { %p2188_p3 = por %p2187_p2, %p2186_p1 }
   0x9   :  { %p2189_p4 = pnand %p2188_p3, %p2182_p0 }
   0xb   :  { %2192 = shalt.err (!%p2189_p4)
}
   0xc   :  { %32 = dma.hbm_to_vmem [thread:$0]  %s2522_s1, 128, %s30_s13, [#allocation6]  }
   0xd   :  { %s2201_s19 = scalar_lea.vmem %s17_s15, 256  ;;  %p2206_p6 = scmp.lt.s32.totalorder %s17_s15, %s17_s15 }
   0xe   :  { %p2202_p5 = scmp.ne.s32.totalorder %s17_s15, %s2201_s19  ;;  %p2207_p7 = scmp.lt.s32.totalorder %s2201_s19, %s2201_s19 }
  0x10   :  { %p2208_p8 = por %p2207_p7, %p2206_p6 }
  0x12   :  { %p2209_p9 = pnand %p2208_p8, %p2202_p5 }
  0x14   :  { %2212 = shalt.err (!%p2209_p9)
}
  0x15   :  { %s2261_s20 = smov 128   ;;  %s2262_s21 = smov 8  }
  0x16   :  { %22 = dma.hbm_to_vmem [thread:$0]  %s2521_s0, 256, %s17_s15, [#allocation3], %s2261_s20, %s2261_s20, %s2262_s21  }
  0x17   :  { %s2263_s24 = smov [#allocation7]  }
  0x18   :  { %s38_s25 = sshll.u32 %s2263_s24, 4  ;;  %s39_s25 = int_to_ptr.vmem [resolvable:$true] %s38_s25 }
  0x19   :  { %s2221_s1 = scalar_lea.vmem %s39_s25, 2560  ;;  %p2226_p11 = scmp.lt.s32.totalorder %s39_s25, %s39_s25 }
  0x1a   :  { %p2222_p10 = scmp.ne.s32.totalorder %s39_s25, %s2221_s1  ;;  %p2227_p12 = scmp.lt.s32.totalorder %s2221_s1, %s2221_s1 }
  0x1c   :  { %p2228_p13 = por %p2227_p12, %p2226_p11 }
  0x1e   :  { %p2229_p0 = pnand %p2228_p13, %p2222_p10 }
  0x20   :  { %2232 = shalt.err (!%p2229_p0)
}
  0x21   :  { %44 = dma.hbm_to_vmem [thread:$0]  %s2523_s2, 2560, %s39_s25, [#allocation6], %s2261_s20, %s2261_s20, %s2262_s21  }
  0x22   :  { %2253 = dma.done.wait [#allocation3], 256  }
  0x23   :  { %2254 = vsyncadd [#allocation3], 4294967040 }
  0x24   :  { %2255 = dma.done.wait [#allocation6], 2688  }
  0x25   :  { %2256 = vsyncadd [#allocation6], 4294964608  ;;  %vm83_vm0 = vcmask 261120   ;;  %v2316_v0 = vld [vmem:[#allocation2] sm:$0xff]  ;;  %v2318_v1 = vld [vmem:[#allocation2 + $0x8] sm:$0xff]  ;;  %v77_v23 = vlaneseq  ;;  %v2264_v39 = vmov 0.0  }
  0x26   :  { %v84_v2 = vsel %vm83_vm0, %v2316_v0, 0.0  ;;  %v87_v3 = vsel %vm83_vm0, %v2318_v1, 0.0  ;;  %v60_v14 = vld [vmem:[#allocation7 + $0x18] sm:$0xff]  ;;  %v59_v15 = vld [vmem:[#allocation7 + $0x10] sm:$0xff]  ;;  %v58_v16 = vld [vmem:[#allocation7 + $0x8] sm:$0xff]  ;;  %2000 = vmatprep.subr.mxu0 %v2264_v39  ;;  %vm2265_vm1 = vmmov 0  }
  0x27   :  { %85 = vadd.xlane.f32.xlu0 %v84_v2  ;;  %1979 = vmatprep.subr.mxu1 %v60_v14  ;;  %v57_v17 = vld [vmem:[#allocation7] sm:$0xff]  ;;  %v2328_v25 = vshrl.u32 %v77_v23, 7  ;;  %v2331_v27 = vld [vmem:[#allocation5] sm:$0xff]  ;;  %s2266_s0 = smov 96   ;;  %vm211_vm2 = vcmask 64512   ;;  %v80_v48 = vand.u32 127, %v77_v23 }
  0x28   :  { %1980 = vmatpush3.msra.mxu1 %v60_v14  ;;  %2002 = vmatprep.mubr.msk.f32.mxu0 %vm2265_vm1, %v2264_v39  ;;  %v2267_v49 = vmov -1e+09   ;;  %s2268_s2 = smov 64   ;;  %s2269_s28 = smov 88   ;;  %vm1564_vm4 = vcmask 195584   ;;  %vm1561_vm5 = vcmask 130048  }
  0x29   :  { %1981 = vmatprep.subr.mxu1 %v59_v15  ;;  %v113_v26 = vsub.s32 0, %v2328_v25  ;;  %v119_v28 = vsub.s32 1, %v2328_v25  ;;  %v125_v40 = vsub.s32 2, %v2328_v25  ;;  %vm81_vm3 = vcmp.le.s32.totalorder %v80_v48, %v2328_v25  ;;  %s2270_s29 = smov 120   ;;  %s2271_s30 = smov 56  }
  0x2a   :  { %1982 = vmatpush3.msra.mxu1 %v59_v15  ;;  %v2365_v50 = vsel %vm81_vm3, 0.0, %v2267_v49  ;;  %s2272_s4 = smov 80   ;;  %s2273_s5 = smov 112   ;;  %vm1783_vm6 = vcmask 523264  }
  0x2b   :  { %88 = vadd.xlane.f32.xlu0 %v87_v3  ;;  %1983 = vmatprep.subr.mxu1 %v58_v16  ;;  %v114_v29 = vrot.slane %v2331_v27, %v113_v26  ;;  %v120_v32 = vrot.slane %v2331_v27, %v119_v28  ;;  %v126_v41 = vrot.slane %v2331_v27, %v125_v40  ;;  %s2274_s6 = smov 48   ;;  %s2275_s7 = smov 72  }
  0x2c   :  { %1984 = vmatpush3.msra.mxu1 %v58_v16  ;;  %s2276_s8 = smov 104   ;;  %s2277_s9 = smov 40  }
  0x2d   :  { %1985 = vmatprep.subr.mxu1 %v57_v17  ;;  %s2278_s10 = smov 16   ;;  %s2279_s11 = smov 24  }
  0x2e   :  { %1986 = vmatpush3.msra.mxu1 %v57_v17  ;;  %s2280_s12 = smov [#allocation8]  }
  0x2f   :  { %1990 = vmatprep.subr.mxu1 %v2264_v39  ;;  %s1874_s13 = sshll.u32 %s2280_s12, 4  ;;  %s1875_s13 = int_to_ptr.vmem [resolvable:$true] %s1874_s13 }
  0x30   :  { %s2233_s14 = scalar_lea.vmem %s1875_s13, 256  ;;  %p2238_p2 = scmp.lt.s32.totalorder %s1875_s13, %s1875_s13 }
  0x31   :  { %p2234_p1 = scmp.ne.s32.totalorder %s1875_s13, %s2233_s14  ;;  %p2239_p3 = scmp.lt.s32.totalorder %s2233_s14, %s2233_s14 }
  0x33   :  { %p2240_p4 = por %p2239_p3, %p2238_p2 }
  0x35   :  { %p2241_p5 = pnand %p2240_p4, %p2234_p1 }
  0xb0   :  { %v86_v4 = vpop.xlane.xlu0 %85 }
  0xb1   :  { %v91_v5 = vmul.f32 0.03125, %v86_v4 }
  0xb3   :  { %v93_v6 = vsub.f32 %v2316_v0, %v91_v5 }
  0xb4   :  { %v89_v7 = vpop.xlane.xlu0 %88 }
  0xb5   :  { %v92_v8 = vmul.f32 0.03125, %v89_v7  ;;  %v95_v9 = vmul.f32 %v93_v6, %v93_v6 }
  0xb7   :  { %v94_v10 = vsub.f32 %v2318_v1, %v92_v8  ;;  %v97_v11 = vsel %vm83_vm0, %v95_v9, 0.0 }
  0xb8   :  { %98 = vadd.xlane.f32.xlu1 %v97_v11 }
  0xb9   :  { %v96_v12 = vmul.f32 %v94_v10, %v94_v10 }
  0xbb   :  { %v100_v13 = vsel %vm83_vm0, %v96_v12, 0.0 }
  0xbc   :  { %101 = vadd.xlane.f32.xlu1 %v100_v13 }
 0x141   :  { %v99_v18 = vpop.xlane.xlu1 %98 }
 0x142   :  { %v103_v19 = vmul.f32 0.03125, %v99_v18 }
 0x144   :  { %v105_v20 = vadd.f32 1e-05, %v103_v19 }
 0x145   :  { %v102_v21 = vpop.xlane.xlu1 %101 }
 0x146   :  { %2133 = vrsqrt.f32 %v105_v20  ;;  %v104_v22 = vmul.f32 0.03125, %v102_v21 }
 0x148   :  { %v106_v24 = vadd.f32 1e-05, %v104_v22 }
 0x14a   :  { %2135 = vrsqrt.f32 %v106_v24 }
 0x153   :  { %v2134_v30 = vpop.eup %2133 }
 0x154   :  { %v109_v31 = vmul.f32 %v2134_v30, %v93_v6 }
 0x156   :  { %v115_v33 = vmul.f32 %v114_v29, %v109_v31 }
 0x157   :  { %v2136_v34 = vpop.eup %2135 }
 0x158   :  { %v110_v35 = vmul.f32 %v2136_v34, %v94_v10  ;;  %v121_v36 = vadd.f32 %v120_v32, %v115_v33 }
 0x15a   :  { %v116_v37 = vmul.f32 %v114_v29, %v110_v35  ;;  %1987 = vmatprep.mubr.msk.f32.mxu1 %vm83_vm0, %v121_v36 }
 0x15c   :  { %v122_v38 = vadd.f32 %v120_v32, %v116_v37 }
 0x15e   :  { %1988 = vmatmul.mubr.msk.f32.vlgmr.msra.gmra.mxu1 %vm83_vm0, %v122_v38 }
 0x15f   :  { %1992 = vmatprep.mubr.msk.f32.mxu1 %vm2265_vm1, %v2264_v39 }
 0x21e   :  { %v1989_v42 = vpop.f32.mrf.mxu1 }
 0x21f   :  { %v2346_v43 = vadd.f32 %v1989_v42, %v126_v41 }
 0x220   :  { %v199_v44 = vpop.f32.mrf.mxu1 }
 0x221   :  { %v2348_v45 = vadd.f32 %v199_v44, %v126_v41  ;;  %287 = vrot.lane.b32.xlu1 %v2346_v43, %s2266_s0 }
 0x223   :  { %209 = vrot.lane.b32.xlu0 %v2348_v45, %s2266_s0 }
 0x293   :  { %v288_v47 = vpop.permute.xlu1 %287 }
 0x295   :  { %v210_v46 = vpop.permute.xlu0 %209 }
 0x296   :  { %1991 = vmatpush3.xpose.msk.msra.mxu1 %vm211_vm2, %v210_v46 }
 0x297   :  { %1995 = vmatprep.subr.mxu1 %v2264_v39 }
 0x299   :  { %1993 = vmatmul.mubr.msk.f32.vlgmr.msra.gmra.mxu1 %vm211_vm2, %v2348_v45 }
 0x29a   :  { %1996 = vmatpush3.xpose.msk.msra.mxu1 %vm211_vm2, %v288_v47  ;;  %1997 = vmatprep.mubr.msk.f32.mxu1 %vm2265_vm1, %v2264_v39 }
 0x29b   :  { %2005 = vmatprep.subr.mxu1 %v2264_v39 }
 0x29d   :  { %1998 = vmatmul.mubr.msk.f32.vlgmr.msra.gmra.mxu1 %vm211_vm2, %v2346_v43 }
 0x29e   :  { %2007 = vmatprep.mubr.msk.f32.mxu1 %vm2265_vm1, %v2264_v39 }
 0x359   :  { %v282_v51 = vpop.f32.mrf.mxu1 }
 0x35a   :  { %v283_v52 = vadd.f32 %v282_v51, %v2365_v50 }
 0x35b   :  { %v1994_v53 = vpop.f32.mrf.mxu1 }
 0x35c   :  { %v363_v54 = vsel %vm211_vm2, %v283_v52, -inf }
 0x35d   :  { %364 = vmax.xlane.f32.xlu1 %v363_v54  ;;  %v359_v55 = vpop.f32.mrf.mxu1 }
 0x35e   :  { %v360_v56 = vadd.f32 %v359_v55, %v2365_v50 }
 0x35f   :  { %v1999_v57 = vpop.f32.mrf.mxu1 }
 0x360   :  { %v366_v58 = vsel %vm211_vm2, %v360_v56, -inf }
 0x361   :  { %367 = vmax.xlane.f32.xlu0 %v366_v58 }
 0x36e   :  { %463 = vrot.lane.b32.xlu1 %v2346_v43, %s2268_s2 }
 0x372   :  { %541 = vrot.lane.b32.xlu1 %v2348_v45, %s2269_s28 }
 0x376   :  { %619 = vrot.lane.b32.xlu1 %v2346_v43, %s2269_s28 }
 0x3e6   :  { %v365_v59 = vpop.xlane.xlu1 %364 }
 0x3e7   :  { %v369_v60 = vsub.f32 %v283_v52, %v365_v59 }
 0x3e9   :  { %v371_v61 = vmul.f32 1.442695, %v369_v60 }
 0x3ea   :  { %v464_v62 = vpop.permute.xlu1 %463  ;;  %v368_v63 = vpop.xlane.xlu0 %367 }
 0x3eb   :  { %2137 = vpow2.f32 %v371_v61  ;;  %v370_v2 = vsub.f32 %v360_v56, %v368_v63  ;;  %2006 = vmatpush3.msra.mxu1 %v464_v62 }
 0x3ec   :  { %2015 = vmatprep.subr.mxu1 %v2264_v39 }
 0x3ed   :  { %v373_v3 = vmul.f32 1.442695, %v370_v2 }
 0x3ee   :  { %v542_v8 = vpop.permute.xlu1 %541 }
 0x3ef   :  { %2139 = vpow2.f32 %v373_v3 }
 0x3f2   :  { %v620_v9 = vpop.permute.xlu1 %619 }
 0x3f8   :  { %v2138_v4 = vpop.eup %2137 }
 0x3f9   :  { %v375_v5 = vsel %vm211_vm2, %v2138_v4, 0.0 }
 0x3fa   :  { %376 = vadd.xlane.f32.xlu0 %v375_v5 }
 0x3fc   :  { %v2140_v6 = vpop.eup %2139 }
 0x3fd   :  { %v378_v7 = vsel %vm211_vm2, %v2140_v6, 0.0 }
 0x3fe   :  { %379 = vadd.xlane.f32.xlu1 %v378_v7 }
 0x40f   :  { %617 = vrot.lane.b32.xlu1 %v2346_v43, %s2270_s29 }
 0x410   :  { %387 = vrot.lane.b32.xlu0 %v2348_v45, %s2268_s2 }
 0x414   :  { %539 = vrot.lane.b32.xlu0 %v2348_v45, %s2270_s29 }
 0x483   :  { %v377_v10 = vpop.xlane.xlu0 %376 }
 0x484   :  { %v381_v11 = vmax.f32 %v377_v10, 1e-20 }
 0x486   :  { %2141 = vrcp.f32 %v381_v11 }
 0x487   :  { %v380_v12 = vpop.xlane.xlu1 %379  ;;  %v388_v13 = vpop.permute.xlu0 %387 }
 0x488   :  { %v382_v14 = vmax.f32 %v380_v12, 1e-20  ;;  %2001 = vmatpush3.msra.mxu0 %v388_v13 }
 0x489   :  { %2010 = vmatprep.subr.mxu0 %v2264_v39 }
 0x48a   :  { %2143 = vrcp.f32 %v382_v14 }
 0x48b   :  { %v540_v19 = vpop.permute.xlu0 %539  ;;  %v618_v20 = vpop.permute.xlu1 %617 }
 0x493   :  { %v2142_v15 = vpop.eup %2141 }
 0x494   :  { %v385_v16 = vmul.f32 %v2142_v15, %v2138_v4 }
 0x496   :  { %2003 = vmatmul.mubr.msk.f32.vlgmr.msra.gmra.mxu0 %vm211_vm2, %v385_v16 }
 0x497   :  { %v2144_v17 = vpop.eup %2143  ;;  %2011 = vmatpush3.xpose.msk.msra.mxu0 %vm211_vm2, %v542_v8  ;;  %2012 = vmatprep.mubr.msk.f32.mxu0 %vm2265_vm1, %v2264_v39 }
 0x498   :  { %v386_v18 = vmul.f32 %v2144_v17, %v2140_v6  ;;  %2020 = vmatprep.subr.mxu0 %v2264_v39 }
 0x49a   :  { %2008 = vmatmul.mubr.msk.f32.vlgmr.msra.gmra.mxu1 %vm211_vm2, %v386_v18  ;;  %2013 = vmatmul.mubr.msk.f32.vlgmr.msra.gmra.mxu0 %vm211_vm2, %v540_v19 }
 0x49b   :  { %2016 = vmatpush3.xpose.msk.msra.mxu1 %vm211_vm2, %v620_v9  ;;  %2017 = vmatprep.mubr.msk.f32.mxu1 %vm2265_vm1, %v2264_v39 }
 0x49c   :  { %2025 = vmatprep.subr.mxu1 %v2264_v39  ;;  %2022 = vmatprep.mubr.msk.f32.mxu0 %vm2265_vm1, %v2264_v39 }
 0x49e   :  { %2018 = vmatmul.mubr.msk.f32.vlgmr.msra.gmra.mxu1 %vm211_vm2, %v618_v20 }
 0x49f   :  { %2027 = vmatprep.mubr.msk.f32.mxu1 %vm2265_vm1, %v2264_v39 }
 0x556   :  { %v2397_v21 = vpop.f32.mrf.mxu0 }
 0x558   :  { %v2004_v22 = vpop.f32.mrf.mxu0 }
 0x55a   :  { %v2399_v23 = vpop.f32.mrf.mxu1  ;;  %v613_v24 = vpop.f32.mrf.mxu0 }
 0x55b   :  { %v614_v26 = vadd.f32 %v613_v24, %v2365_v50 }
 0x55c   :  { %v2009_v28 = vpop.f32.mrf.mxu1  ;;  %v2014_v29 = vpop.f32.mrf.mxu0 }
 0x55d   :  { %v695_v30 = vsel %vm211_vm2, %v614_v26, -inf }
 0x55e   :  { %696 = vmax.xlane.f32.xlu0 %v695_v30  ;;  %v691_v31 = vpop.f32.mrf.mxu1 }
 0x55f   :  { %v692_v32 = vadd.f32 %v691_v31, %v2365_v50 }
 0x560   :  { %v2019_v33 = vpop.f32.mrf.mxu1 }
 0x561   :  { %v698_v34 = vsel %vm211_vm2, %v692_v32, -inf }
 0x562   :  { %699 = vmax.xlane.f32.xlu1 %v698_v34 }
 0x573   :  { %795 = vrot.lane.b32.xlu1 %v2346_v43, %s2271_s30 }
 0x577   :  { %873 = vrot.lane.b32.xlu1 %v2348_v45, %s2272_s4 }
 0x57b   :  { %951 = vrot.lane.b32.xlu1 %v2346_v43, %s2272_s4 }
 0x57f   :  { %949 = vrot.lane.b32.xlu1 %v2346_v43, %s2273_s5 }
 0x5e7   :  { %v697_v35 = vpop.xlane.xlu0 %696 }
 0x5e8   :  { %v701_v36 = vsub.f32 %v614_v26, %v697_v35 }
 0x5ea   :  { %v703_v37 = vmul.f32 1.442695, %v701_v36 }
 0x5eb   :  { %v700_v38 = vpop.xlane.xlu1 %699 }
 0x5ec   :  { %2145 = vpow2.f32 %v703_v37  ;;  %v702_v40 = vsub.f32 %v692_v32, %v700_v38 }
 0x5ee   :  { %v705_v41 = vmul.f32 1.442695, %v702_v40 }
 0x5ef   :  { %v796_v42 = vpop.permute.xlu1 %795 }
 0x5f0   :  { %2147 = vpow2.f32 %v705_v41  ;;  %2026 = vmatpush3.msra.mxu1 %v796_v42 }
 0x5f1   :  { %2035 = vmatprep.subr.mxu1 %v2264_v39 }
 0x5f3   :  { %v874_v55 = vpop.permute.xlu1 %873 }
 0x5f7   :  { %v952_v59 = vpop.permute.xlu1 %951 }
 0x5f9   :  { %v2146_v44 = vpop.eup %2145 }
 0x5fa   :  { %v707_v46 = vsel %vm211_vm2, %v2146_v44, 0.0 }
 0x5fb   :  { %708 = vadd.xlane.f32.xlu0 %v707_v46  ;;  %v950_v62 = vpop.permute.xlu1 %949 }
 0x5fd   :  { %v2148_v47 = vpop.eup %2147 }
 0x5fe   :  { %v710_v48 = vsel %vm211_vm2, %v2148_v47, 0.0 }
 0x5ff   :  { %711 = vadd.xlane.f32.xlu0 %v710_v48 }
 0x615   :  { %719 = vrot.lane.b32.xlu0 %v2348_v45, %s2271_s30 }
 0x619   :  { %871 = vrot.lane.b32.xlu0 %v2348_v45, %s2273_s5 }
 0x684   :  { %v709_v49 = vpop.xlane.xlu0 %708 }
 0x685   :  { %v713_v51 = vmax.f32 %v709_v49, 1e-20 }
 0x687   :  { %2149 = vrcp.f32 %v713_v51 }
 0x688   :  { %v712_v52 = vpop.xlane.xlu0 %711 }
 0x689   :  { %v714_v53 = vmax.f32 %v712_v52, 1e-20 }
 0x68b   :  { %2151 = vrcp.f32 %v714_v53 }
 0x68c   :  { %v720_v54 = vpop.permute.xlu0 %719 }
 0x68d   :  { %2021 = vmatpush3.msra.mxu0 %v720_v54 }
 0x68e   :  { %2030 = vmatprep.subr.mxu0 %v2264_v39 }
 0x690   :  { %v872_v61 = vpop.permute.xlu0 %871 }
 0x694   :  { %v2150_v56 = vpop.eup %2149 }
 0x695   :  { %v717_v57 = vmul.f32 %v2150_v56, %v2146_v44 }
 0x697   :  { %2023 = vmatmul.mubr.msk.f32.vlgmr.msra.gmra.mxu0 %vm211_vm2, %v717_v57 }
 0x698   :  { %v2152_v58 = vpop.eup %2151  ;;  %2031 = vmatpush3.xpose.msk.msra.mxu0 %vm211_vm2, %v874_v55  ;;  %2032 = vmatprep.mubr.msk.f32.mxu0 %vm2265_vm1, %v2264_v39 }
 0x699   :  { %v718_v60 = vmul.f32 %v2152_v58, %v2148_v47  ;;  %2040 = vmatprep.subr.mxu0 %v2264_v39 }
 0x69b   :  { %2028 = vmatmul.mubr.msk.f32.vlgmr.msra.gmra.mxu1 %vm211_vm2, %v718_v60  ;;  %2033 = vmatmul.mubr.msk.f32.vlgmr.msra.gmra.mxu0 %vm211_vm2, %v872_v61 }
 0x69c   :  { %2036 = vmatpush3.xpose.msk.msra.mxu1 %vm211_vm2, %v952_v59  ;;  %2037 = vmatprep.mubr.msk.f32.mxu1 %vm2265_vm1, %v2264_v39 }
 0x69d   :  { %2045 = vmatprep.subr.mxu1 %v2264_v39  ;;  %2042 = vmatprep.mubr.msk.f32.mxu0 %vm2265_vm1, %v2264_v39 }
 0x69f   :  { %2038 = vmatmul.mubr.msk.f32.vlgmr.msra.gmra.mxu1 %vm211_vm2, %v950_v62 }
 0x6a0   :  { %2047 = vmatprep.mubr.msk.f32.mxu1 %vm2265_vm1, %v2264_v39 }
 0x757   :  { %v2431_v63 = vpop.f32.mrf.mxu0 }
 0x759   :  { %v2024_v2 = vpop.f32.mrf.mxu0 }
 0x75b   :  { %v2433_v3 = vpop.f32.mrf.mxu1  ;;  %v945_v4 = vpop.f32.mrf.mxu0 }
 0x75c   :  { %v946_v5 = vadd.f32 %v945_v4, %v2365_v50 }
 0x75d   :  { %v2029_v6 = vpop.f32.mrf.mxu1  ;;  %v2034_v7 = vpop.f32.mrf.mxu0 }
 0x75e   :  { %v1027_v8 = vsel %vm211_vm2, %v946_v5, -inf }
 0x75f   :  { %1028 = vmax.xlane.f32.xlu0 %v1027_v8  ;;  %v1023_v9 = vpop.f32.mrf.mxu1 }
 0x760   :  { %v1024_v10 = vadd.f32 %v1023_v9, %v2365_v50 }
 0x761   :  { %v2039_v11 = vpop.f32.mrf.mxu1 }
 0x762   :  { %v1030_v12 = vsel %vm211_vm2, %v1024_v10, -inf }
 0x763   :  { %1031 = vmax.xlane.f32.xlu1 %v1030_v12  ;;  %v64_v12 = vld [vmem:[#allocation7 + $0x38] sm:$0xff] }
 0x774   :  { %1127 = vrot.lane.b32.xlu1 %v2346_v43, %s2274_s6 }
 0x778   :  { %1205 = vrot.lane.b32.xlu1 %v2348_v45, %s2275_s7 }
 0x77c   :  { %1283 = vrot.lane.b32.xlu1 %v2346_v43, %s2275_s7 }
 0x780   :  { %1281 = vrot.lane.b32.xlu1 %v2346_v43, %s2276_s8 }
 0x7e8   :  { %v1029_v13 = vpop.xlane.xlu0 %1028 }
 0x7e9   :  { %v1033_v14 = vsub.f32 %v946_v5, %v1029_v13  ;;  %v63_v13 = vld [vmem:[#allocation7 + $0x30] sm:$0xff] }
 0x7eb   :  { %v1035_v15 = vmul.f32 1.442695, %v1033_v14  ;;  %v61_v14 = vld [vmem:[#allocation7 + $0x20] sm:$0xff] }
 0x7ec   :  { %v1032_v16 = vpop.xlane.xlu1 %1031 }
 0x7ed   :  { %2153 = vpow2.f32 %v1035_v15  ;;  %v1034_v17 = vsub.f32 %v1024_v10, %v1032_v16 }
 0x7ef   :  { %v1037_v18 = vmul.f32 1.442695, %v1034_v17 }
 0x7f0   :  { %v1128_v19 = vpop.permute.xlu1 %1127 }
 0x7f1   :  { %2155 = vpow2.f32 %v1037_v18  ;;  %2046 = vmatpush3.msra.mxu1 %v1128_v19 }
 0x7f2   :  { %2055 = vmatprep.subr.mxu1 %v2264_v39 }
 0x7f4   :  { %v1206_v33 = vpop.permute.xlu1 %1205 }
 0x7f8   :  { %v1284_v37 = vpop.permute.xlu1 %1283 }
 0x7fa   :  { %v2154_v20 = vpop.eup %2153 }
 0x7fb   :  { %v1039_v22 = vsel %vm211_vm2, %v2154_v20, 0.0 }
 0x7fc   :  { %1040 = vadd.xlane.f32.xlu0 %v1039_v22  ;;  %v1282_v41 = vpop.permute.xlu1 %1281 }
 0x7fe   :  { %v2156_v24 = vpop.eup %2155 }
 0x7ff   :  { %v1042_v26 = vsel %vm211_vm2, %v2156_v24, 0.0 }
 0x800   :  { %1043 = vadd.xlane.f32.xlu0 %v1042_v26 }
 0x816   :  { %1051 = vrot.lane.b32.xlu0 %v2348_v45, %s2274_s6 }
 0x81a   :  { %1203 = vrot.lane.b32.xlu0 %v2348_v45, %s2276_s8 }
 0x885   :  { %v1041_v28 = vpop.xlane.xlu0 %1040 }
 0x886   :  { %v1045_v29 = vmax.f32 %v1041_v28, 1e-20 }
 0x888   :  { %2157 = vrcp.f32 %v1045_v29 }
 0x889   :  { %v1044_v30 = vpop.xlane.xlu0 %1043 }
 0x88a   :  { %v1046_v31 = vmax.f32 %v1044_v30, 1e-20 }
 0x88c   :  { %2159 = vrcp.f32 %v1046_v31 }
 0x88d   :  { %v1052_v32 = vpop.permute.xlu0 %1051 }
 0x88e   :  { %2041 = vmatpush3.msra.mxu0 %v1052_v32 }
 0x88f   :  { %2050 = vmatprep.subr.mxu0 %v2264_v39 }
 0x891   :  { %v1204_v40 = vpop.permute.xlu0 %1203 }
 0x895   :  { %v2158_v34 = vpop.eup %2157 }
 0x896   :  { %v1049_v35 = vmul.f32 %v2158_v34, %v2154_v20 }
 0x898   :  { %2043 = vmatmul.mubr.msk.f32.vlgmr.msra.gmra.mxu0 %vm211_vm2, %v1049_v35  ;;  %v1569_v35 = vsub.s32 3, %v2328_v25 }
 0x899   :  { %v2160_v36 = vpop.eup %2159  ;;  %2051 = vmatpush3.xpose.msk.msra.mxu0 %vm211_vm2, %v1206_v33  ;;  %2052 = vmatprep.mubr.msk.f32.mxu0 %vm2265_vm1, %v2264_v39 }
 0x89a   :  { %v1050_v38 = vmul.f32 %v2160_v36, %v2156_v24  ;;  %2060 = vmatprep.subr.mxu0 %v2264_v39  ;;  %v1570_v36 = vrot.slane %v2331_v27, %v1569_v35 }
 0x89c   :  { %2048 = vmatmul.mubr.msk.f32.vlgmr.msra.gmra.mxu1 %vm211_vm2, %v1050_v38  ;;  %2053 = vmatmul.mubr.msk.f32.vlgmr.msra.gmra.mxu0 %vm211_vm2, %v1204_v40 }
 0x89d   :  { %2056 = vmatpush3.xpose.msk.msra.mxu1 %vm211_vm2, %v1284_v37  ;;  %2057 = vmatprep.mubr.msk.f32.mxu1 %vm2265_vm1, %v2264_v39 }
 0x89e   :  { %2065 = vmatprep.subr.mxu1 %v2264_v39  ;;  %2062 = vmatprep.mubr.msk.f32.mxu0 %vm2265_vm1, %v2264_v39 }
 0x8a0   :  { %2058 = vmatmul.mubr.msk.f32.vlgmr.msra.gmra.mxu1 %vm211_vm2, %v1282_v41 }
 0x8a1   :  { %2067 = vmatprep.mubr.msk.f32.mxu1 %vm2265_vm1, %v2264_v39 }
 0x958   :  { %v1123_v42 = vpop.f32.mrf.mxu0 }
 0x95a   :  { %v2044_v44 = vpop.f32.mrf.mxu0 }
 0x95c   :  { %v1199_v46 = vpop.f32.mrf.mxu1  ;;  %v1277_v47 = vpop.f32.mrf.mxu0 }
 0x95d   :  { %v1278_v48 = vadd.f32 %v1277_v47, %v2365_v50 }
 0x95e   :  { %v2049_v49 = vpop.f32.mrf.mxu1  ;;  %v2054_v51 = vpop.f32.mrf.mxu0 }
 0x95f   :  { %v1359_v52 = vsel %vm211_vm2, %v1278_v48, -inf }
 0x960   :  { %1360 = vmax.xlane.f32.xlu0 %v1359_v52  ;;  %v1355_v53 = vpop.f32.mrf.mxu1 }
 0x961   :  { %v1356_v54 = vadd.f32 %v1355_v53, %v2365_v50 }
 0x962   :  { %v2059_v55 = vpop.f32.mrf.mxu1 }
 0x963   :  { %v1362_v56 = vsel %vm211_vm2, %v1356_v54, -inf  ;;  %v68_v55 = vld [vmem:[#allocation7 + $0x58] sm:$0xff] }
 0x964   :  { %1363 = vmax.xlane.f32.xlu1 %v1362_v56  ;;  %v67_v56 = vld [vmem:[#allocation7 + $0x50] sm:$0xff] }
 0x975   :  { %1459 = vrot.lane.b32.xlu1 %v2346_v43, %s2277_s9 }
 0x979   :  { %1537 = vrot.lane.b32.xlu1 %v2431_v63, %s2262_s21 }
 0x97d   :  { %1539 = vrot.lane.b32.xlu1 %v2433_v3, %s2262_s21 }
 0x981   :  { %1547 = vrot.lane.b32.xlu1 %v1199_v46, %s2278_s10 }
 0x9e9   :  { %v1361_v39 = vpop.xlane.xlu0 %1360 }
 0x9ea   :  { %v1365_v57 = vsub.f32 %v1278_v48, %v1361_v39  ;;  %v66_v39 = vld [vmem:[#allocation7 + $0x48] sm:$0xff] }
 0x9ec   :  { %v1367_v58 = vmul.f32 1.442695, %v1365_v57  ;;  %v65_v57 = vld [vmem:[#allocation7 + $0x40] sm:$0xff] }
 0x9ed   :  { %v1364_v59 = vpop.xlane.xlu1 %1363 }
 0x9ee   :  { %2161 = vpow2.f32 %v1367_v58  ;;  %v1366_v50 = vsub.f32 %v1356_v54, %v1364_v59  ;;  %v76_v58 = vld [vmem:[#allocation7 + $0x98] sm:$0xff]  ;;  %v75_v59 = vld [vmem:[#allocation7 + $0x90] sm:$0xff] }
 0x9f0   :  { %v1369_v60 = vmul.f32 1.442695, %v1366_v50  ;;  %v74_v50 = vld [vmem:[#allocation7 + $0x88] sm:$0xff] }
 0x9f1   :  { %v1460_v61 = vpop.permute.xlu1 %1459 }
 0x9f2   :  { %2163 = vpow2.f32 %v1369_v60  ;;  %2066 = vmatpush3.msra.mxu1 %v1460_v61  ;;  %v73_v60 = vld [vmem:[#allocation7 + $0x80] sm:$0xff] }
 0x9f3   :  { %2081 = vmatprep.subr.mxu1 %v68_v55 }
 0x9f5   :  { %v1538_v19 = vpop.permute.xlu1 %1537 }
 0x9f6   :  { %v1559_v24 = vsel %vm211_vm2, %v2397_v21, %v1538_v19  ;;  %v1694_v19 = vsub.s32 6, %v2328_v25 }
 0x9f9   :  { %v1540_v20 = vpop.permute.xlu1 %1539 }
 0x9fa   :  { %v1560_v31 = vsel %vm211_vm2, %v2399_v23, %v1540_v20  ;;  %v1695_v20 = vrot.slane %v2331_v27, %v1694_v19 }
 0x9fb   :  { %v2162_v62 = vpop.eup %2161 }
 0x9fc   :  { %v1371_v43 = vsel %vm211_vm2, %v2162_v62, 0.0 }
 0x9fd   :  { %1372 = vadd.xlane.f32.xlu0 %v1371_v43  ;;  %v1548_v26 = vpop.permute.xlu1 %1547 }
 0x9fe   :  { %v1563_v32 = vsel %vm1561_vm5, %v1560_v31, %v1548_v26  ;;  %v1781_v31 = vsub.s32 7, %v2328_v25 }
 0x9ff   :  { %v2164_v63 = vpop.eup %2163 }
 0xa00   :  { %v1374_v2 = vsel %vm211_vm2, %v2164_v63, 0.0 }
 0xa01   :  { %1375 = vadd.xlane.f32.xlu0 %v1374_v2 }
 0xa17   :  { %1383 = vrot.lane.b32.xlu0 %v2348_v45, %s2277_s9  ;;  %v62_v45 = vld [vmem:[#allocation7 + $0x28] sm:$0xff] }
 0xa1b   :  { %1545 = vrot.lane.b32.xlu0 %v1123_v42, %s2278_s10 }
 0xa86   :  { %v1373_v3 = vpop.xlane.xlu0 %1372 }
 0xa87   :  { %v1377_v4 = vmax.f32 %v1373_v3, 1e-20 }
 0xa89   :  { %2165 = vrcp.f32 %v1377_v4  ;;  %v1682_v4 = vsub.s32 4, %v2328_v25 }
 0xa8a   :  { %v1376_v5 = vpop.xlane.xlu0 %1375 }
 0xa8b   :  { %v1378_v6 = vmax.f32 %v1376_v5, 1e-20  ;;  %v1688_v5 = vsub.s32 5, %v2328_v25 }
 0xa8d   :  { %2167 = vrcp.f32 %v1378_v6  ;;  %v1683_v6 = vrot.slane %v2331_v27, %v1682_v4 }
 0xa8e   :  { %v1384_v7 = vpop.permute.xlu0 %1383 }
 0xa8f   :  { %2061 = vmatpush3.msra.mxu0 %v1384_v7 }
 0xa90   :  { %2070 = vmatprep.subr.mxu0 %v64_v12 }
 0xa92   :  { %v1546_v22 = vpop.permute.xlu0 %1545 }
 0xa93   :  { %v1562_v28 = vsel %vm1561_vm5, %v1559_v24, %v1546_v22 }
 0xa96   :  { %v2166_v8 = vpop.eup %2165 }
 0xa97   :  { %v1381_v9 = vmul.f32 %v2166_v8, %v2162_v62 }
 0xa99   :  { %2063 = vmatmul.mubr.msk.f32.vlgmr.msra.gmra.mxu0 %vm211_vm2, %v1381_v9  ;;  %v1689_v9 = vrot.slane %v2331_v27, %v1688_v5 }
 0xa9a   :  { %v2168_v10 = vpop.eup %2167  ;;  %2071 = vmatpush3.msra.mxu0 %v64_v12 }
 0xa9b   :  { %v1382_v11 = vmul.f32 %v2168_v10, %v2164_v63  ;;  %2072 = vmatprep.subr.mxu0 %v63_v13 }
 0xa9c   :  { %2073 = vmatpush3.msra.mxu0 %v63_v13 }
 0xa9d   :  { %2068 = vmatmul.mubr.msk.f32.vlgmr.msra.gmra.mxu1 %vm211_vm2, %v1382_v11  ;;  %2074 = vmatprep.subr.mxu0 %v62_v45 }
 0xa9e   :  { %2075 = vmatpush3.msra.mxu0 %v62_v45  ;;  %2082 = vmatpush3.msra.mxu1 %v68_v55 }
 0xa9f   :  { %2076 = vmatprep.subr.mxu0 %v61_v14  ;;  %2083 = vmatprep.subr.mxu1 %v67_v56 }
 0xaa0   :  { %2077 = vmatpush3.msra.mxu0 %v61_v14  ;;  %2084 = vmatpush3.msra.mxu1 %v67_v56 }
 0xaa1   :  { %2085 = vmatprep.subr.mxu1 %v66_v39  ;;  %2092 = vmatprep.subr.mxu0 %v76_v58 }
 0xaa2   :  { %2086 = vmatpush3.msra.mxu1 %v66_v39 }
 0xaa3   :  { %2087 = vmatprep.subr.mxu1 %v65_v57 }
 0xaa4   :  { %2088 = vmatpush3.msra.mxu1 %v65_v57 }
 0xb59   :  { %v1455_v15 = vpop.f32.mrf.mxu0 }
 0xb5a   :  { %1553 = vrot.lane.b32.xlu0 %v1455_v15, %s2279_s11  ;;  %v72_v15 = vld [vmem:[#allocation7 + $0x78] sm:$0xff] }
 0xb5b   :  { %v2064_v16 = vpop.f32.mrf.mxu0 }
 0xb5c   :  { %v71_v16 = vld [vmem:[#allocation7 + $0x70] sm:$0xff] }
 0xb5d   :  { %v1531_v17 = vpop.f32.mrf.mxu1 }
 0xb5e   :  { %1555 = vrot.lane.b32.xlu1 %v1531_v17, %s2279_s11  ;;  %v70_v17 = vld [vmem:[#allocation7 + $0x68] sm:$0xff] }
 0xb5f   :  { %v2069_v18 = vpop.f32.mrf.mxu1 }
 0xb60   :  { %v69_v18 = vld [vmem:[#allocation7 + $0x60] sm:$0xff] }
 0xbcc   :  { %v1554_v29 = vpop.permute.xlu0 %1553 }
 0xbcd   :  { %v1565_v30 = vsel %vm1564_vm4, %v1562_v28, %v1554_v29 }
 0xbce   :  { %2078 = vmatprep.mubr.msk.f32.mxu0 %vm83_vm0, %v1565_v30 }
 0xbd0   :  { %v1556_v33 = vpop.permute.xlu1 %1555 }
 0xbd1   :  { %v1566_v34 = vsel %vm1564_vm4, %v1563_v32, %v1556_v33  ;;  %v1782_v32 = vrot.slane %v2331_v27, %v1781_v31 }
 0xbd2   :  { %2079 = vmatmul.mubr.msk.f32.vlgmr.msra.gmra.mxu0 %vm83_vm0, %v1566_v34 }
 0xbd3   :  { %2093 = vmatpush3.msra.mxu0 %v76_v58 }
 0xbd4   :  { %2094 = vmatprep.subr.mxu0 %v75_v59 }
 0xbd5   :  { %2095 = vmatpush3.msra.mxu0 %v75_v59 }
 0xbd6   :  { %2096 = vmatprep.subr.mxu0 %v74_v50 }
 0xbd7   :  { %2097 = vmatpush3.msra.mxu0 %v74_v50 }
 0xbd8   :  { %2098 = vmatprep.subr.mxu0 %v73_v60 }
 0xbd9   :  { %2099 = vmatpush3.msra.mxu0 %v73_v60 }
 0xbda   :  { %2100 = vmatprep.subr.mxu0 %v72_v15 }
 0xbdb   :  { %2101 = vmatpush3.msra.mxu0 %v72_v15 }
 0xbdc   :  { %2102 = vmatprep.subr.mxu0 %v71_v16 }
 0xbdd   :  { %2103 = vmatpush3.msra.mxu0 %v71_v16 }
 0xbde   :  { %2104 = vmatprep.subr.mxu0 %v70_v17 }
 0xbdf   :  { %2105 = vmatpush3.msra.mxu0 %v70_v17 }
 0xbe0   :  { %2106 = vmatprep.subr.mxu0 %v69_v18 }
 0xbe1   :  { %2107 = vmatpush3.msra.mxu0 %v69_v18 }
 0xc92   :  { %v2080_v21 = vpop.f32.mrf.mxu0 }
 0xc93   :  { %v1649_v37 = vadd.f32 %v2080_v21, %v1570_v36 }
 0xc94   :  { %v1643_v38 = vpop.f32.mrf.mxu0 }
 0xc95   :  { %v2488_v40 = vadd.f32 %v1649_v37, %v2318_v1  ;;  %v1644_v41 = vadd.f32 %v1643_v38, %v1570_v36 }
 0xc97   :  { %v2491_v42 = vadd.f32 %v1644_v41, %v2316_v0  ;;  %v1657_v23 = vsel %vm83_vm0, %v2488_v40, 0.0 }
 0xc98   :  { %1658 = vadd.xlane.f32.xlu1 %v1657_v23 }
 0xc99   :  { %v1654_v44 = vsel %vm83_vm0, %v2491_v42, 0.0 }
 0xc9a   :  { %1655 = vadd.xlane.f32.xlu0 %v1654_v44 }
 0xd21   :  { %v1659_v46 = vpop.xlane.xlu1 %1658 }
 0xd22   :  { %v1661_v47 = vmul.f32 0.03125, %v1659_v46 }
 0xd23   :  { %v1656_v48 = vpop.xlane.xlu0 %1655 }
 0xd24   :  { %v1660_v49 = vmul.f32 0.03125, %v1656_v48  ;;  %v1663_v51 = vsub.f32 %v2488_v40, %v1661_v47 }
 0xd26   :  { %v1662_v1 = vsub.f32 %v2491_v42, %v1660_v49  ;;  %v1665_v53 = vmul.f32 %v1663_v51, %v1663_v51 }
 0xd28   :  { %v1664_v52 = vmul.f32 %v1662_v1, %v1662_v1  ;;  %v1669_v54 = vsel %vm83_vm0, %v1665_v53, 0.0 }
 0xd2a   :  { %v1666_v0 = vsel %vm83_vm0, %v1664_v52, 0.0 }
 0xd2b   :  { %1667 = vadd.xlane.f32.xlu0 %v1666_v0 }
 0xd2f   :  { %1670 = vadd.xlane.f32.xlu0 %v1669_v54 }
 0xdb4   :  { %v1668_v61 = vpop.xlane.xlu0 %1667 }
 0xdb5   :  { %v1672_v62 = vmul.f32 0.03125, %v1668_v61 }
 0xdb7   :  { %v1674_v43 = vadd.f32 1e-05, %v1672_v62 }
 0xdb8   :  { %v1671_v63 = vpop.xlane.xlu0 %1670 }
 0xdb9   :  { %2169 = vrsqrt.f32 %v1674_v43  ;;  %v1673_v2 = vmul.f32 0.03125, %v1671_v63 }
 0xdbb   :  { %v1675_v3 = vadd.f32 1e-05, %v1673_v2 }
 0xdbd   :  { %2171 = vrsqrt.f32 %v1675_v3 }
 0xdc6   :  { %v2170_v7 = vpop.eup %2169 }
 0xdc7   :  { %v1678_v8 = vmul.f32 %v2170_v7, %v1662_v1 }
 0xdc9   :  { %v1684_v10 = vmul.f32 %v1683_v6, %v1678_v8 }
 0xdca   :  { %v2172_v11 = vpop.eup %2171 }
 0xdcb   :  { %v1679_v12 = vmul.f32 %v2172_v11, %v1663_v51  ;;  %v1690_v13 = vadd.f32 %v1689_v9, %v1684_v10 }
 0xdcd   :  { %v1685_v45 = vmul.f32 %v1683_v6, %v1679_v12  ;;  %2089 = vmatprep.mubr.msk.f32.mxu1 %vm83_vm0, %v1690_v13 }
 0xdcf   :  { %v1691_v14 = vadd.f32 %v1689_v9, %v1685_v45 }
 0xdd1   :  { %2090 = vmatmul.mubr.msk.f32.vlgmr.msra.gmra.mxu1 %vm83_vm0, %v1691_v14 }
 0xe91   :  { %v2091_v22 = vpop.f32.mrf.mxu1 }
 0xe92   :  { %v1774_v24 = vadd.f32 %v2091_v22, %v1695_v20 }
 0xe93   :  { %v1768_v26 = vpop.f32.mrf.mxu1 }
 0xe94   :  { %v1769_v28 = vadd.f32 %v1768_v26, %v1695_v20  ;;  %v1778_v30 = vmax.f32 %v1774_v24, 0.0 }
 0xe96   :  { %v1777_v29 = vmax.f32 %v1769_v28, 0.0 }
 0xe98   :  { %2108 = vmatprep.mubr.msk.f32.mxu0 %vm1783_vm6, %v1777_v29 }
 0xe99   :  { %2109 = vmatmul.mubr.msk.f32.vlgmr.msra.gmra.mxu0 %vm1783_vm6, %v1778_v30 }
 0xf59   :  { %v2110_v33 = vpop.f32.mrf.mxu0 }
 0xf5a   :  { %v1862_v34 = vadd.f32 %v2110_v33, %v1782_v32 }
 0xf5b   :  { %v1856_v35 = vpop.f32.mrf.mxu0 }
 0xf5c   :  { %v1866_v36 = vadd.f32 %v1862_v34, %v2488_v40  ;;  %v1857_v21 = vadd.f32 %v1856_v35, %v1782_v32 }
 0xf5e   :  { %1868 = vst.msk [vmem:[#allocation8 + $0x8] sm:$0xff] %vm83_vm0, %v1866_v36  ;;  %v1865_v37 = vadd.f32 %v1857_v21, %v2491_v42 }
 0xf60   :  { %1867 = vst.msk [vmem:[#allocation8] sm:$0xff] %vm83_vm0, %v1865_v37 }
 0xf61   :  { %2244 = shalt.err (!%p2241_p5)
}
 0xf62   :  { %1880 = dma.vmem_to_hbm [thread:$0]  %s1875_s13, 256, %s2524_s3, [#allocation4], %s2261_s20, %s2261_s20, %s2262_s21  }
 0xf63   :  { %2257 = dma.done.wait [#allocation4], 256  }
 0xf64   :  { %2258 = vsyncadd [#allocation4], 4294967040 }
 0xf65   :  { %1884 = vsyncpa [#allocation3], 1 }
 0xf66   :  { %1885 = vsyncpa [#allocation6], 1 }
 0xf67   :  { %1886 = vsyncpa [#allocation4], 1 }

</bundles_post_ra>
